<compile_context>
chip_gen: v7x
topology: tpu7x:2x2x1
jax: 0.10.0
libtpu: 0.0.40
codegen_flags: <defaults>
</compile_context>

<pallas_src>
import functools

import numpy as np
import jax
import jax.numpy as jnp
from jax.experimental import pallas as pl
from jax.experimental.pallas import tpu as pltpu

# (vocab_size, embedding_dim) per categorical feature — deterministic config.
EMB_SZS = [(16, 8), (32, 16), (24, 8)]

_LANES = 128
_MAX_TB = 256  # cap on batch tile (vreg pressure of the (TB, Vtot) one-hot)


def _embedding_kernel(x_ref, bdiag_ref, out_ref, *, vocab_offsets, vocab_sizes):
    """x_ref: (TB, F) int32; bdiag_ref: (Vtot, Dpad) f32; out_ref: (TB, Dpad)."""
    TB = x_ref.shape[0]
    Vtot = bdiag_ref.shape[0]

    # Single iota, hoisted and reused for every feature (JAX does not CSE
    # broadcast_in_dim).
    iota = jax.lax.broadcasted_iota(jnp.int32, (TB, Vtot), 1)      # (TB, Vtot)

    # Multi-hot selector over the disjoint, concatenated vocabularies.
    hot = None
    for f, (off, vsz) in enumerate(zip(vocab_offsets, vocab_sizes)):  # static
        idx = x_ref[:, f:f + 1]                                     # (TB, 1)
        # Clamp per-feature so invalid indices cannot select a row from the
        # next feature's vocab segment (nn.Embedding would raise instead).
        idx = jnp.clip(idx, 0, vsz - 1)
        gidx = idx + off
        m = iota == gidx                                            # (TB, Vtot)
        hot = m if hot is None else jnp.logical_or(hot, m)

    # One block-diagonal matmul -> already-concatenated (and zero-padded)
    # embeddings.  HIGHEST precision keeps the f32 0/1 selection bit-exact.
    emb = jnp.dot(hot.astype(jnp.float32), bdiag_ref[...],
                  preferred_element_type=jnp.float32,
                  precision=jax.lax.Precision.HIGHEST)              # (TB, Dpad)
    out_ref[...] = emb                                              # lane-dense


def build_fused_table(tables):
    """Host-side (numpy) block-diagonal table, lane-padded to a multiple of 128.

    Call ONCE at init time; do not rebuild per forward call.
    Returns (bdiag_device_array, vocab_offsets, vocab_sizes, Dtot).
    """
    vocabs = [int(t.shape[0]) for t in tables]
    dims = [int(t.shape[1]) for t in tables]
    Vtot, Dtot = sum(vocabs), sum(dims)
    Dpad = max(_LANES, ((Dtot + _LANES - 1) // _LANES) * _LANES)

    bdiag = np.zeros((Vtot, Dpad), np.float32)
    voff = doff = 0
    for t in tables:
        v, d = int(t.shape[0]), int(t.shape[1])
        bdiag[voff:voff + v, doff:doff + d] = np.asarray(t, dtype=np.float32)
        voff += v
        doff += d

    vocab_offsets = tuple(int(sum(vocabs[:i])) for i in range(len(vocabs)))
    return jnp.asarray(bdiag), vocab_offsets, tuple(vocabs), Dtot


def embedding_forward(x, bdiag, vocab_offsets, vocab_sizes, d_total):
    """x: (B, F) int32 indices; bdiag: (Vtot, Dpad) f32 fused table."""
    B, F = x.shape
    assert F == len(vocab_offsets) == len(vocab_sizes)
    Vtot, Dpad = bdiag.shape

    # Batch tile: whole batch in one grid step for small B (kills per-step
    # overhead); otherwise 256-row tiles (multiple of 8) so large batches keep
    # >= 2 parallel grid steps (v7x megacore) without vreg spills.
    if B <= _MAX_TB:
        tb = B
    else:
        tb = _MAX_TB
    grid = (pl.cdiv(B, tb),)

    kernel = functools.partial(_embedding_kernel,
                               vocab_offsets=vocab_offsets,
                               vocab_sizes=vocab_sizes)

    out_padded = pl.pallas_call(
        kernel,
        out_shape=jax.ShapeDtypeStruct((B, Dpad), jnp.float32),
        grid=grid,
        in_specs=[
            pl.BlockSpec((tb, F), lambda i: (i, 0)),      # batch tile of indices
            # Constant index_map -> table stays VMEM resident across steps.
            # TODO(synk): pipeline_mode=pl.Buffered(1) (or pl.ANY + one explicit
            # copy) to avoid double-buffering the table for large vocabularies.
            pl.BlockSpec((Vtot, Dpad), lambda i: (0, 0)),
        ],
        out_specs=pl.BlockSpec((tb, Dpad), lambda i: (i, 0)),
        compiler_params=pltpu.CompilerParams(
            dimension_semantics=("parallel",)),
        cost_estimate=pl.CostEstimate(
            flops=2 * B * Vtot * Dpad,
            transcendentals=0,
            bytes_accessed=(B * F * 4 + Vtot * Dpad * 4 + B * Dpad * 4)),
    )(x, bdiag)

    # Drop the lane padding; result is the concatenated per-feature embeddings.
    return out_padded[:, :d_total]


def embedding_layer(x, tables):
    """Convenience wrapper mirroring EmbeddingLayer.forward (builds the fused
    table; in real use call build_fused_table once and reuse it)."""
    bdiag, vocab_offsets, vocab_sizes, d_total = build_fused_table(tables)
    return embedding_forward(x, bdiag, vocab_offsets, vocab_sizes, d_total)


def embedding_layer_ref(x, tables):
    """Pure-JAX reference mirroring the PyTorch forward."""
    outs = [jnp.take(t, x[..., i], axis=0) for i, t in enumerate(tables)]
    return jnp.concatenate(outs, axis=-1)


if __name__ == "__main__":
    key = jax.random.PRNGKey(0)
    B = 16
    F = len(EMB_SZS)

    # Deterministic "nn.Embedding"-style weights: N(0, 1).
    keys = jax.random.split(key, F + 1)
    tables = [
        jax.random.normal(keys[i], (v, d), dtype=jnp.float32)
        for i, (v, d) in enumerate(EMB_SZS)
    ]

    # Deterministic integer indices, one column per feature, within each vocab.
    idx_cols = []
    for i, (v, _) in enumerate(EMB_SZS):
        idx_cols.append(
            jax.random.randint(jax.random.fold_in(keys[-1], i), (B, 1), 0, v,
                               dtype=jnp.int32))
    x = jnp.concatenate(idx_cols, axis=-1)  # (B, F) int32

    # Build the fused table once (init time), then run the forward.
    bdiag, vocab_offsets, vocab_sizes, d_total = build_fused_table(tables)
    out = embedding_forward(x, bdiag, vocab_offsets, vocab_sizes, d_total)
    out = jax.block_until_ready(out)

    ref = embedding_layer_ref(x, tables)
    assert out.shape == (B, sum(d for _, d in EMB_SZS))
    assert out.dtype == jnp.float32
    assert jnp.allclose(out, ref, atol=1e-6, rtol=1e-6)

    print("KERNEL_OK")
</pallas_src>

<mosaic_0001>
module attributes {stable_mosaic.version = 11 : i64} {
  func.func @_embedding_kernel(%arg0: i32, %arg1: memref<16x3xi32, #tpu.memory_space<vmem>>, %arg2: memref<72x128xf32, #tpu.memory_space<vmem>>, %arg3: memref<16x128xf32, #tpu.memory_space<vmem>>) attributes {dimension_semantics = [#tpu.dimension_semantics<parallel>], iteration_bounds = array<i64: 1>, scalar_prefetch = 0 : i64, scratch_operands = 0 : i64, tpu.core_type = #tpu.core_type<tc>, window_params = [{transform_indices = @transform_0, window_bounds = array<i64: 16, 3>}, {pipeline_mode = #tpu.pipeline_mode<synchronous>, transform_indices = @transform_1, window_bounds = array<i64: 72, 128>}, {transform_indices = @transform_2, window_bounds = array<i64: 16, 128>}]} {
    %0 = tpu.iota {dimensions = array<i32: 1>} : vector<16x72xi32>
    %c0 = arith.constant 0 : index
    %c0_0 = arith.constant 0 : index
    %1 = vector.load %arg1[%c0, %c0_0] : memref<16x3xi32, #tpu.memory_space<vmem>>, vector<16x1xi32>
    %c0_i32 = arith.constant 0 : i32
    %c15_i32 = arith.constant 15 : i32
    %2 = vector.broadcast %c0_i32 : i32 to vector<16x1xi32>
    %3 = arith.maxsi %2, %1 : vector<16x1xi32>
    %4 = vector.broadcast %c15_i32 : i32 to vector<16x1xi32>
    %5 = arith.minsi %4, %3 : vector<16x1xi32>
    %c0_i32_1 = arith.constant 0 : i32
    %6 = vector.broadcast %c0_i32_1 : i32 to vector<16x1xi32>
    %7 = arith.addi %5, %6 : vector<16x1xi32>
    %8 = vector.broadcast %7 : vector<16x1xi32> to vector<16x72xi32>
    %9 = arith.cmpi eq, %0, %8 : vector<16x72xi32>
    %c0_2 = arith.constant 0 : index
    %c1 = arith.constant 1 : index
    %10 = vector.load %arg1[%c0_2, %c1] : memref<16x3xi32, #tpu.memory_space<vmem>>, vector<16x1xi32>
    %c0_i32_3 = arith.constant 0 : i32
    %c31_i32 = arith.constant 31 : i32
    %11 = vector.broadcast %c0_i32_3 : i32 to vector<16x1xi32>
    %12 = arith.maxsi %11, %10 : vector<16x1xi32>
    %13 = vector.broadcast %c31_i32 : i32 to vector<16x1xi32>
    %14 = arith.minsi %13, %12 : vector<16x1xi32>
    %c16_i32 = arith.constant 16 : i32
    %15 = vector.broadcast %c16_i32 : i32 to vector<16x1xi32>
    %16 = arith.addi %14, %15 : vector<16x1xi32>
    %17 = vector.broadcast %16 : vector<16x1xi32> to vector<16x72xi32>
    %18 = arith.cmpi eq, %0, %17 : vector<16x72xi32>
    %19 = arith.ori %9, %18 : vector<16x72xi1>
    %c0_4 = arith.constant 0 : index
    %c2 = arith.constant 2 : index
    %20 = vector.load %arg1[%c0_4, %c2] : memref<16x3xi32, #tpu.memory_space<vmem>>, vector<16x1xi32>
    %c0_i32_5 = arith.constant 0 : i32
    %c23_i32 = arith.constant 23 : i32
    %21 = vector.broadcast %c0_i32_5 : i32 to vector<16x1xi32>
    %22 = arith.maxsi %21, %20 : vector<16x1xi32>
    %23 = vector.broadcast %c23_i32 : i32 to vector<16x1xi32>
    %24 = arith.minsi %23, %22 : vector<16x1xi32>
    %c48_i32 = arith.constant 48 : i32
    %25 = vector.broadcast %c48_i32 : i32 to vector<16x1xi32>
    %26 = arith.addi %24, %25 : vector<16x1xi32>
    %27 = vector.broadcast %26 : vector<16x1xi32> to vector<16x72xi32>
    %28 = arith.cmpi eq, %0, %27 : vector<16x72xi32>
    %29 = arith.ori %19, %28 : vector<16x72xi1>
    %30 = arith.extui %29 : vector<16x72xi1> to vector<16x72xi32>
    %31 = arith.sitofp %30 : vector<16x72xi32> to vector<16x72xf32>
    %c0_6 = arith.constant 0 : index
    %c0_7 = arith.constant 0 : index
    %32 = vector.load %arg2[%c0_6, %c0_7] : memref<72x128xf32, #tpu.memory_space<vmem>>, vector<72x128xf32>
    %cst = arith.constant dense<0.000000e+00> : vector<16x128xf32>
    %33 = tpu.matmul %31, %32, %cst {dimension_numbers = #tpu.dot_dimension_numbers<[1], [0], [0], [1], [0, 0, 1, 1], [], []>, precision = #tpu.contract_precision<fp32>} : vector<16x72xf32>, vector<72x128xf32>, vector<16x128xf32> -> vector<16x128xf32>
    %c0_8 = arith.constant 0 : index
    %c0_9 = arith.constant 0 : index
    %34 = vector.load %arg3[%c0_8, %c0_9] : memref<16x128xf32, #tpu.memory_space<vmem>>, vector<16x128xf32>
    tpu.vector_store %arg3[%c0_8, %c0_9], %33 {strides = array<i32>} : memref<16x128xf32, #tpu.memory_space<vmem>>, vector<16x128xf32>,
    return
  }
  func.func @transform_0(%arg0: i32) -> (i32, i32) {
    %c0_i32 = arith.constant 0 : i32
    %c0_i32_0 = arith.constant 0 : i32
    return %arg0, %c0_i32 : i32, i32
  }
  func.func @transform_1(%arg0: i32) -> (i32, i32) {
    %c0_i32 = arith.constant 0 : i32
    %c0_i32_0 = arith.constant 0 : i32
    %c0_i32_1 = arith.constant 0 : i32
    return %c0_i32, %c0_i32_0 : i32, i32
  }
  func.func @transform_2(%arg0: i32) -> (i32, i32) {
    %c0_i32 = arith.constant 0 : i32
    %c0_i32_0 = arith.constant 0 : i32
    return %arg0, %c0_i32 : i32, i32
  }
}

</mosaic_0001>

<bundles_post_ra>
// kernel: tpu_custom_call.1
= control target key start
LH: loop header
LB: loop body
LE: loop exit
PB: predicated region body
PF: predicated region fallthrough
CT: control target
= control target key end

     0   :  { %7 = vsyncpa [#allocation3], 0  ;;  %s1222_s0 = inlined_call_operand.vmem [shape: s32[16,3], index: 0, kind: input, shape index: {}]   ;;  %s1223_s1 = inlined_call_operand.hbm [shape: f32[72,128], index: 1, kind: input, shape index: {}]   ;;  %s1224_s2 = inlined_call_operand.hbm [shape: f32[16,128], index: 2, kind: output, shape index: {}]  }
   0x1   :  { %8 = vsyncpa [#allocation4], 0  ;;  %s1078_s9 = smov [#allocation2]   ;;  %s1030_s13 = scalar_lea.hbm %s1223_s1, 1152 }
   0x2   :  { %s16_s10 = sshll.u32 %s1078_s9, 4  ;;  %p1031_p0 = scmp.ne.s32.totalorder %s1223_s1, %s1030_s13  ;;  %s17_s10 = int_to_ptr.vmem [resolvable:$true] %s16_s10 }
   0x3   :  { %p1034_p1 = scmp.lt.u32.totalorder %s1030_s13, %s1223_s1 }
   0x5   :  { %p1036_p2 = pnand %p1034_p1, %p1031_p0 }
   0x7   :  { %1039 = shalt.err (!%p1036_p2)
}
   0x8   :  { %s1040_s18 = scalar_lea.vmem %s17_s10, 1152  ;;  %p1045_p4 = scmp.lt.s32.totalorder %s17_s10, %s17_s10 }
   0x9   :  { %p1041_p3 = scmp.ne.s32.totalorder %s17_s10, %s1040_s18  ;;  %p1046_p5 = scmp.lt.s32.totalorder %s1040_s18, %s1040_s18 }
   0xb   :  { %p1047_p6 = por %p1046_p5, %p1045_p4 }
   0xd   :  { %p1048_p7 = pnand %p1047_p6, %p1041_p3 }
   0xf   :  { %1051 = shalt.err (!%p1048_p7)
}
  0x10   :  { %s1079_s19 = smov 128   ;;  %s1080_s20 = smov 8  }
  0x11   :  { %22 = dma.hbm_to_vmem [thread:$0]  %s1223_s1, 1152, %s17_s10, [#allocation3], %s1079_s19, %s1079_s19, %s1080_s20  }
  0x12   :  { %1074 = dma.done.wait [#allocation3], 1152  }
  0x13   :  { %1075 = vsyncadd [#allocation3], 4294966144  ;;  %v1081_v0 = vmov 0   ;;  %v29_v1 = vld [vmem:[%s1222_s0 + $0x8] sm:$0xff]  ;;  %v28_v2 = vld [vmem:[%s1222_s0] sm:$0xff]  ;;  %v1082_v22 = vmov 1  }
  0x14   :  { %1025 = vset.pattern.permute.xlu1 %v1081_v0  ;;  %1024 = vset.pattern.permute.xlu0 %v1081_v0  ;;  %v82_v3 = vld [vmem:[#allocation2] sm:$0xff]  ;;  %vm32_vm0 = vcmp.gt.s32.totalorder %v29_v1, 0  ;;  %vm30_vm1 = vcmp.gt.s32.totalorder %v28_v2, 0  ;;  %v83_v4 = vld [vmem:[#allocation2 + $0x8] sm:$0xff]  ;;  %v84_v13 = vld [vmem:[#allocation2 + $0x10] sm:$0xff]  ;;  %v1083_v33 = vmov 2  }
  0x15   :  { %v33_v5 = vsel %vm32_vm0, %v29_v1, 0  ;;  %v31_v6 = vsel %vm30_vm1, %v28_v2, 0  ;;  %v99_v7 = vand.u32 4294901760, %v82_v3  ;;  %v102_v8 = vand.u32 4294901760, %v83_v4  ;;  %v85_v14 = vld [vmem:[#allocation2 + $0x18] sm:$0xff]  ;;  %v86_v24 = vld [vmem:[#allocation2 + $0x20] sm:$0xff] }
  0x16   :  { %vm36_vm2 = vcmp.lt.s32.totalorder %v33_v5, 15  ;;  %vm34_vm3 = vcmp.lt.s32.totalorder %v31_v6, 15  ;;  %vm48_vm4 = vcmp.lt.s32.totalorder %v33_v5, 31  ;;  %vm46_vm5 = vcmp.lt.s32.totalorder %v31_v6, 31  ;;  %v87_v25 = vld [vmem:[#allocation2 + $0x28] sm:$0xff]  ;;  %v88_v31 = vld [vmem:[#allocation2 + $0x30] sm:$0xff] }
  0x17   :  { %v37_v9 = vsel %vm36_vm2, %v33_v5, 15  ;;  %v35_v10 = vsel %vm34_vm3, %v31_v6, 15  ;;  %v49_v11 = vsel %vm48_vm4, %v33_v5, 31  ;;  %v47_v12 = vsel %vm46_vm5, %v31_v6, 31  ;;  %v89_v32 = vld [vmem:[#allocation2 + $0x38] sm:$0xff]  ;;  %v1140_v39 = vld [vmem:[#allocation2 + $0x40] sm:$0xff] }
  0x18   :  { %42 = vperm.xlu1 %1025, %v37_v9   ;;  %39 = vperm.xlu0 %1024, %v35_v10   ;;  %vm62_vm6 = vcmp.lt.s32.totalorder %v31_v6, 23  ;;  %vm64_vm7 = vcmp.lt.s32.totalorder %v33_v5, 23  ;;  %v51_v15 = vadd.s32 16, %v49_v11  ;;  %v50_v16 = vadd.s32 16, %v47_v12  ;;  %s1085_s0 = smov [#allocation5]  }
  0x19   :  { %v1122_v17 = vpack.c.bf16 %v102_v8, %v99_v7  ;;  %v105_v18 = vand.u32 4294901760, %v84_v13  ;;  %v108_v19 = vand.u32 4294901760, %v85_v14  ;;  %v63_v20 = vsel %vm62_vm6, %v31_v6, 23  ;;  %s698_s1 = sshll.u32 %s1085_s0, 4  ;;  %s699_s1 = int_to_ptr.vmem [resolvable:$true] %s698_s1 }
  0x1a   :  { %v65_v21 = vsel %vm64_vm7, %v33_v5, 23  ;;  %v111_v26 = vand.u32 4294901760, %v86_v24  ;;  %v114_v27 = vand.u32 4294901760, %v87_v25  ;;  %v66_v28 = vadd.s32 48, %v63_v20  ;;  %s1052_s27 = scalar_lea.vmem %s699_s1, 256  ;;  %p1057_p9 = scmp.lt.s32.totalorder %s699_s1, %s699_s1 }
  0x1b   :  { %959 = vmatprep.subr.bf16.mxu0 %v1122_v17  ;;  %911 = vmatprep.subr.bf16.mxu1 %v1122_v17  ;;  %v1126_v23 = vpack.c.bf16 %v108_v19, %v105_v18  ;;  %v67_v29 = vadd.s32 48, %v65_v21  ;;  %v117_v34 = vand.u32 4294901760, %v88_v31  ;;  %v120_v35 = vand.u32 4294901760, %v89_v32  ;;  %p1053_p8 = scmp.ne.s32.totalorder %s699_s1, %s1052_s27  ;;  %p1058_p10 = scmp.lt.s32.totalorder %s1052_s27, %s1052_s27 }
  0x1c   :  { %1027 = vset.pattern.permute.xlu1 %v1082_v22  ;;  %1026 = vset.pattern.permute.xlu0 %v1082_v22  ;;  %v1132_v30 = vpack.c.bf16 %v114_v27, %v111_v26  ;;  %v194_v37 = vsub.f32 %v82_v3, %v99_v7  ;;  %v201_v38 = vsub.f32 %v83_v4, %v102_v8  ;;  %v1147_v42 = vand.u32 4294901760, %v1140_v39 }
  0x1d   :  { %56 = vperm.xlu1 %1027, %v51_v15   ;;  %53 = vperm.xlu0 %1026, %v50_v16   ;;  %v1138_v36 = vpack.c.bf16 %v120_v35, %v117_v34  ;;  %v208_v45 = vsub.f32 %v84_v13, %v105_v18  ;;  %v215_v46 = vsub.f32 %v85_v14, %v108_v19  ;;  %v26_v22 = vlaneseq  ;;  %p1059_p11 = por %p1058_p10, %p1057_p9 }
  0x1e   :  { %961 = vmatpush3.bf16.msra.mxu0 %v1122_v17  ;;  %913 = vmatpush3.bf16.msra.mxu1 %v1122_v17  ;;  %v195_v40 = vand.u32 4294901760, %v194_v37  ;;  %v202_v41 = vand.u32 4294901760, %v201_v38  ;;  %v222_v54 = vsub.f32 %v86_v24, %v111_v26  ;;  %v229_v55 = vsub.f32 %v87_v25, %v114_v27 }
  0x1f   :  { %963 = vmatprep.subr.bf16.mxu0 %v1126_v23  ;;  %915 = vmatprep.subr.bf16.mxu1 %v1126_v23  ;;  %v209_v49 = vand.u32 4294901760, %v208_v45  ;;  %v216_v51 = vand.u32 4294901760, %v215_v46  ;;  %v236_v1 = vsub.f32 %v88_v31, %v117_v34  ;;  %v243_v3 = vsub.f32 %v89_v32, %v120_v35  ;;  %p1060_p12 = pnand %p1059_p11, %p1053_p8 }
  0x20   :  { %v196_v43 = vsub.f32 %v194_v37, %v195_v40  ;;  %v203_v44 = vsub.f32 %v201_v38, %v202_v41  ;;  %v1152_v50 = vpack.c.bf16 %v202_v41, %v195_v40  ;;  %v223_v59 = vand.u32 4294901760, %v222_v54 }
  0x21   :  { %1028 = vset.pattern.permute.xlu1 %v1083_v33  ;;  %1029 = vset.pattern.permute.xlu0 %v1083_v33  ;;  %v210_v53 = vsub.f32 %v208_v45, %v209_v49  ;;  %v1157_v56 = vpack.c.bf16 %v216_v51, %v209_v49  ;;  %v217_v57 = vsub.f32 %v215_v46, %v216_v51  ;;  %v230_v60 = vand.u32 4294901760, %v229_v55 }
  0x22   :  { %69 = vperm.xlu1 %1028, %v66_v28   ;;  %72 = vperm.xlu0 %1029, %v67_v29   ;;  %v197_v47 = vand.u32 4294901760, %v196_v43  ;;  %v204_v48 = vand.u32 4294901760, %v203_v44  ;;  %v224_v63 = vsub.f32 %v222_v54, %v223_v59  ;;  %v237_v6 = vand.u32 4294901760, %v236_v1 }
  0x23   :  { %965 = vmatpush3.bf16.msra.mxu0 %v1126_v23  ;;  %917 = vmatpush3.bf16.msra.mxu1 %v1126_v23  ;;  %v211_v58 = vand.u32 4294901760, %v210_v53  ;;  %v218_v61 = vand.u32 4294901760, %v217_v57  ;;  %v1163_v62 = vpack.c.bf16 %v230_v60, %v223_v59  ;;  %v231_v0 = vsub.f32 %v229_v55, %v230_v60 }
  0x24   :  { %967 = vmatprep.subr.bf16.mxu0 %v1132_v30  ;;  %919 = vmatprep.subr.bf16.mxu1 %v1132_v30  ;;  %v1155_v52 = vpack.c.bf16 %v204_v48, %v197_v47  ;;  %v225_v4 = vand.u32 4294901760, %v224_v63  ;;  %v244_v7 = vand.u32 4294901760, %v243_v3  ;;  %v238_v9 = vsub.f32 %v236_v1, %v237_v6 }
  0x25   :  { %v930_v2 = vpack.c.bf16 %v218_v61, %v211_v58  ;;  %v232_v5 = vand.u32 4294901760, %v231_v0  ;;  %v1165_v15 = vpack.c.bf16 %v201_v38, %v194_v37  ;;  %v1167_v16 = vpack.c.bf16 %v215_v46, %v208_v45 }
  0x26   :  { %v986_v10 = vpack.c.bf16 %v244_v7, %v237_v6  ;;  %v245_v11 = vsub.f32 %v243_v3, %v244_v7  ;;  %v239_v12 = vand.u32 4294901760, %v238_v9  ;;  %v1169_v18 = vpack.c.bf16 %v229_v55, %v222_v54 }
  0x27   :  { %969 = vmatpush3.bf16.msra.mxu0 %v1132_v30  ;;  %921 = vmatpush3.bf16.msra.mxu1 %v1132_v30  ;;  %v934_v8 = vpack.c.bf16 %v232_v5, %v225_v4  ;;  %v1171_v19 = vpack.c.bf16 %v243_v3, %v236_v1  ;;  %v27_v24 = vand.u32 127, %v26_v22  ;;  %vm91_vm15 = vcmask 588800  }
  0x28   :  { %971 = vmatprep.subr.bf16.mxu0 %v1138_v36  ;;  %923 = vmatprep.subr.bf16.mxu1 %v1138_v36  ;;  %v246_v13 = vand.u32 4294901760, %v245_v11  ;;  %v1084_v29 = vmov 0.0   ;;  %v250_v46 = vsub.f32 %v1140_v39, %v1147_v42 }
  0x2a   :  { %v938_v14 = vpack.c.bf16 %v246_v13, %v239_v12  ;;  %v251_v47 = vand.u32 4294901760, %v250_v46 }
  0x2b   :  { %973 = vmatpush3.bf16.msra.mxu0 %v1138_v36  ;;  %925 = vmatpush3.bf16.msra.mxu1 %v1138_v36 }
  0x2c   :  { %863 = vmatprep.subr.mxu0 %v1147_v42  ;;  %800 = vmatprep.subr.mxu1 %v1147_v42  ;;  %v252_v48 = vsub.f32 %v250_v46, %v251_v47 }
  0x2e   :  { %v253_v39 = vand.u32 4294901760, %v252_v48 }
  0x2f   :  { %864 = vmatpush3.msra.mxu0 %v1147_v42  ;;  %801 = vmatpush3.msra.mxu1 %v1147_v42 }
  0x30   :  { %975 = vmatprep.subr.bf16.mxu0 %v1152_v50  ;;  %927 = vmatprep.subr.bf16.mxu1 %v1155_v52 }
  0x97   :  { %v43_v20 = vpop.permute.xlu1 %42  ;;  %v40_v21 = vpop.permute.xlu0 %39 }
  0x98   :  { %vm45_vm10 = vcmp.eq.s32.totalorder %v27_v24, %v43_v20  ;;  %vm44_vm11 = vcmp.eq.s32.totalorder %v27_v24, %v40_v21 }
  0x9c   :  { %v57_v25 = vpop.permute.xlu1 %56  ;;  %v54_v26 = vpop.permute.xlu0 %53 }
  0x9d   :  { %vm59_vm8 = vcmp.eq.s32.totalorder %v27_v24, %v57_v25  ;;  %vm58_vm9 = vcmp.eq.s32.totalorder %v27_v24, %v54_v26 }
  0x9e   :  { %vm61_vm12 = vmor %vm45_vm10, %vm59_vm8 }
  0x9f   :  { %vm60_vm13 = vmor %vm44_vm11, %vm58_vm9 }
  0xa1   :  { %v70_v27 = vpop.permute.xlu1 %69  ;;  %v73_v28 = vpop.permute.xlu0 %72 }
  0xa2   :  { %vm74_vm14 = vcmp.eq.s32.totalorder %v27_v24, %v70_v27  ;;  %vm75_vm0 = vcmp.eq.s32.totalorder %v27_v24, %v73_v28 }
  0xa3   :  { %vm76_vm1 = vmor %vm60_vm13, %vm74_vm14 }
  0xa4   :  { %v710_v31 = vsel %vm76_vm1, 1.0, %v1084_v29  ;;  %vm77_vm2 = vmor %vm61_vm12, %vm75_vm0 }
  0xa5   :  { %v711_v32 = vsel %vm77_vm2, 1.0, %v1084_v29  ;;  %v93_v33 = vsel %vm91_vm15, %v710_v31, 0 }
  0xa6   :  { %v96_v34 = vsel %vm91_vm15, %v711_v32, 0  ;;  %v173_v35 = vsub.f32 %v93_v33, %v93_v33 }
  0xa7   :  { %v183_v37 = vsub.f32 %v96_v34, %v96_v34 }
  0xa8   :  { %v174_v38 = vand.u32 4294901760, %v173_v35 }
  0xa9   :  { %v184_v40 = vand.u32 4294901760, %v183_v37 }
  0xaa   :  { %865 = vmatprep.mubr.f32.mxu0 %v174_v38  ;;  %v175_v41 = vsub.f32 %v173_v35, %v174_v38 }
  0xab   :  { %866 = vmatmul.mubr.f32.vlgmr.msra.gmra.mrb[0].mxu0 %v184_v40  ;;  %v185_v43 = vsub.f32 %v183_v37, %v184_v40 }
  0xac   :  { %977 = vmatpush3.bf16.msra.mxu0 %v1152_v50  ;;  %886 = vmatprep.mubr.msk.f32.mxu0 %vm91_vm15, %v710_v31  ;;  %v176_v44 = vand.u32 4294901760, %v175_v41 }
  0xad   :  { %979 = vmatprep.subr.bf16.mxu0 %v1157_v56  ;;  %v186_v45 = vand.u32 4294901760, %v185_v43 }
  0xae   :  { %802 = vmatprep.mubr.f32.mxu1 %v176_v44 }
  0xaf   :  { %803 = vmatmul.mubr.f32.vlgmr.msra.gmra.mrb[0].mxu1 %v186_v45 }
  0xb0   :  { %929 = vmatpush3.bf16.msra.mxu1 %v1155_v52  ;;  %981 = vmatpush3.bf16.msra.mxu0 %v1157_v56 }
  0xb1   :  { %823 = vmatprep.mubr.msk.f32.mxu1 %vm91_vm15, %v710_v31  ;;  %931 = vmatprep.subr.bf16.mxu1 %v930_v2 }
  0xb2   :  { %983 = vmatprep.subr.bf16.mxu0 %v1163_v62 }
  0xb4   :  { %933 = vmatpush3.bf16.msra.mxu1 %v930_v2  ;;  %985 = vmatpush3.bf16.msra.mxu0 %v1163_v62 }
  0xb5   :  { %935 = vmatprep.subr.bf16.mxu1 %v934_v8  ;;  %987 = vmatprep.subr.bf16.mxu0 %v986_v10 }
  0xb8   :  { %937 = vmatpush3.bf16.msra.mxu1 %v934_v8  ;;  %989 = vmatpush3.bf16.msra.mxu0 %v986_v10 }
  0xb9   :  { %939 = vmatprep.subr.bf16.mxu1 %v938_v14  ;;  %884 = vmatprep.subr.mxu0 %v251_v47 }
  0xbc   :  { %941 = vmatpush3.bf16.msra.mxu1 %v938_v14  ;;  %885 = vmatpush3.msra.mxu0 %v251_v47 }
  0xbd   :  { %887 = vmatmul.mubr.msk.f32.vlgmr.msra.gmra.mrb[0].mxu0 %vm91_vm15, %v711_v32  ;;  %991 = vmatprep.subr.bf16.mxu0 %v1122_v17 }
  0xbe   :  { %993 = vmatpush3.bf16.msra.mxu0 %v1122_v17  ;;  %907 = vmatprep.mubr.msk.f32.mxu0 %vm91_vm15, %v710_v31 }
  0xbf   :  { %821 = vmatprep.subr.mxu1 %v253_v39  ;;  %995 = vmatprep.subr.bf16.mxu0 %v1126_v23 }
  0xc0   :  { %822 = vmatpush3.msra.mxu1 %v253_v39 }
  0xc1   :  { %824 = vmatmul.mubr.msk.f32.vlgmr.msra.gmra.mrb[0].mxu1 %vm91_vm15, %v711_v32  ;;  %943 = vmatprep.subr.bf16.mxu1 %v1165_v15 }
  0xc2   :  { %945 = vmatpush3.bf16.msra.mxu1 %v1165_v15  ;;  %844 = vmatprep.mubr.f32.mxu1 %v173_v35 }
  0xc3   :  { %997 = vmatpush3.bf16.msra.mxu0 %v1126_v23  ;;  %947 = vmatprep.subr.bf16.mxu1 %v1167_v16 }
  0xc4   :  { %999 = vmatprep.subr.bf16.mxu0 %v1132_v30 }
  0xc6   :  { %949 = vmatpush3.bf16.msra.mxu1 %v1167_v16 }
  0xc7   :  { %1001 = vmatpush3.bf16.msra.mxu0 %v1132_v30  ;;  %951 = vmatprep.subr.bf16.mxu1 %v1169_v18 }
  0xc8   :  { %1003 = vmatprep.subr.bf16.mxu0 %v1138_v36 }
  0xca   :  { %953 = vmatpush3.bf16.msra.mxu1 %v1169_v18 }
  0xcb   :  { %1005 = vmatpush3.bf16.msra.mxu0 %v1138_v36  ;;  %955 = vmatprep.subr.bf16.mxu1 %v1171_v19 }
  0xcc   :  { %905 = vmatprep.subr.mxu0 %v1147_v42 }
  0xce   :  { %957 = vmatpush3.bf16.msra.mxu1 %v1171_v19 }
  0xcf   :  { %906 = vmatpush3.msra.mxu0 %v1147_v42  ;;  %842 = vmatprep.subr.mxu1 %v250_v46 }
  0xd0   :  { %908 = vmatmul.mubr.msk.f32.vlgmr.msra.gmra.mrb[0].mxu0 %vm91_vm15, %v711_v32 }
  0xd2   :  { %843 = vmatpush3.msra.mxu1 %v250_v46 }
  0xd3   :  { %845 = vmatmul.mubr.f32.vlgmr.msra.gmra.mrb[0].mxu1 %v183_v37 }
 0x1a3   :  { %v909_v17 = vpop.f32.mrb[0].mxu0 }
 0x1a4   :  { %v681_v23 = vpop.f32.mrb[1].mxu0 }
 0x1a6   :  { %v846_v30 = vpop.f32.mrb[0].mxu1 }
 0x1a7   :  { %v1006_v49 = vadd.f32 %v909_v17, %v846_v30  ;;  %v400_v36 = vpop.f32.mrb[1].mxu1 }
 0x1a8   :  { %v1007_v50 = vadd.f32 %v681_v23, %v400_v36 }
 0x1a9   :  { %692 = vst [vmem:[#allocation5 + $0x8] sm:$0xff] %v1006_v49 }
 0x1aa   :  { %691 = vst [vmem:[#allocation5] sm:$0xff] %v1007_v50 }
 0x1ab   :  { %1063 = shalt.err (!%p1060_p12)
}
 0x1ac   :  { %s1064_s30 = scalar_lea.hbm %s1224_s2, 256 }
 0x1ad   :  { %p1065_p13 = scmp.ne.s32.totalorder %s1224_s2, %s1064_s30  ;;  %p1068_p0 = scmp.lt.u32.totalorder %s1064_s30, %s1224_s2 }
 0x1af   :  { %p1070_p1 = pnand %p1068_p0, %p1065_p13 }
 0x1b1   :  { %1073 = shalt.err (!%p1070_p1)
}
 0x1b2   :  { %704 = dma.vmem_to_hbm [thread:$0]  %s699_s1, 256, %s1224_s2, [#allocation4], %s1079_s19, %s1079_s19, %s1080_s20  }
 0x1b3   :  { %1076 = dma.done.wait [#allocation4], 256  }
 0x1b4   :  { %1077 = vsyncadd [#allocation4], 4294967040 }
 0x1b5   :  { %708 = vsyncpa [#allocation3], 1 }
 0x1b6   :  { %709 = vsyncpa [#allocation4], 1 }

</bundles_post_ra>
